<compile_context>
chip_gen: v7x
topology: tpu7x:2x2x1
jax: 0.10.0
libtpu: 0.0.40
codegen_flags: <defaults>
</compile_context>

<pallas_src>
import jax
import jax.numpy as jnp
from jax.experimental import pallas as pl
from jax.experimental.pallas import tpu as pltpu

H_CHUNK = 128  # hidden-dim chunk that stays resident in vregs


def _round_up(n, m):
    return ((n + m - 1) // m) * m


def kan_kernel(x_ref, w1_ref, b1_ref, w2_ref, b2_ref, o_ref):
    # x_ref : (tile_b, F)  f32   (cast to bf16 in-kernel for the MXU)
    # w1_ref: (F, H)       bf16  (layer1.weight^T, resident across grid steps)
    # b1_ref: (1, H)       f32
    # w2_ref: (H, F)       bf16  (fc.weight^T, resident across grid steps)
    # b2_ref: (1, F)       f32
    # o_ref : (tile_b, F)  f32
    x = x_ref[...].astype(jnp.bfloat16)
    H = w1_ref.shape[1]
    n_chunks = H // H_CHUNK

    acc = jnp.zeros(o_ref.shape, jnp.float32)
    # Trace-time loop over 128-wide hidden chunks: all slices are static and
    # lane/sublane aligned; the full (tile_b, H) hidden is never materialized.
    for c in range(n_chunks):
        lo = c * H_CHUNK
        hi = lo + H_CHUNK
        # h_chunk = relu(x @ W1[:, lo:hi] + b1[lo:hi])  -- bias/relu in f32
        h = jnp.dot(x, w1_ref[:, lo:hi], preferred_element_type=jnp.float32)
        h = jnp.maximum(h + b1_ref[:, lo:hi], 0.0).astype(jnp.bfloat16)
        # y += h_chunk @ W2[lo:hi, :]  (f32 accumulator)
        acc = acc + jnp.dot(h, w2_ref[lo:hi, :], preferred_element_type=jnp.float32)

    o_ref[...] = (acc + b2_ref[...]).astype(o_ref.dtype)


def kan_forward(x, w1_t, b1, w2_t, b2, *, tile_b=256):
    """x: (B, F) f32. w1_t: (F, H), b1: (1, H), w2_t: (H, F), b2: (1, F)."""
    B, F = x.shape
    H = w1_t.shape[1]
    assert H % H_CHUNK == 0, "hidden dim (512 in the module) must be a multiple of 128"

    # Fixed sublane-aligned batch tile; pad ragged batches instead of asserting.
    tile_b = min(tile_b, _round_up(B, 8))
    B_pad = _round_up(B, tile_b)
    grid_b = B_pad // tile_b

    x_p = x.astype(jnp.float32)
    if B_pad != B:
        x_p = jnp.pad(x_p, ((0, B_pad - B), (0, 0)))

    # One-time bf16 cast of the (tiny) weights; biases stay f32.
    w1_bf = w1_t.astype(jnp.bfloat16)
    w2_bf = w2_t.astype(jnp.bfloat16)
    b1_f = b1.astype(jnp.float32).reshape(1, H)
    b2_f = b2.astype(jnp.float32).reshape(1, F)

    cost = pl.CostEstimate(
        flops=4 * B_pad * F * H,
        transcendentals=0,
        bytes_accessed=int(
            x_p.size * 4 + B_pad * F * 4
            + w1_bf.size * 2 + w2_bf.size * 2 + b1_f.size * 4 + b2_f.size * 4
        ),
    )

    out = pl.pallas_call(
        kan_kernel,
        out_shape=jax.ShapeDtypeStruct((B_pad, F), jnp.float32),
        grid_spec=pltpu.PrefetchScalarGridSpec(
            num_scalar_prefetch=0,
            grid=(grid_b,),
            in_specs=[
                pl.BlockSpec((tile_b, F), lambda i: (i, 0)),  # x tile (pipelined over batch)
                pl.BlockSpec((F, H), lambda i: (0, 0)),       # W1^T (resident)
                pl.BlockSpec((1, H), lambda i: (0, 0)),       # b1
                pl.BlockSpec((H, F), lambda i: (0, 0)),       # W2^T (resident)
                pl.BlockSpec((1, F), lambda i: (0, 0)),       # b2
            ],
            out_specs=pl.BlockSpec((tile_b, F), lambda i: (i, 0)),
        ),
        compiler_params=pltpu.CompilerParams(
            dimension_semantics=("parallel",),
        ),
        cost_estimate=cost,
    )(x_p, w1_bf, b1_f, w2_bf, b2_f)

    # Strip batch padding (if any) back to the module's (B, F) output.
    return out[:B] if B_pad != B else out


def kan_reference(x, w1_t, b1, w2_t, b2):
    h = jnp.maximum(x @ w1_t + b1, 0.0)
    return h @ w2_t + b2


if __name__ == "__main__":
    key = jax.random.PRNGKey(0)
    B, F, H = 8, 32, 512  # batch, in_features, hidden (512 fixed by the module)

    kx, kw1, kb1, kw2, kb2 = jax.random.split(key, 5)
    x = jax.random.normal(kx, (B, F), dtype=jnp.float32)

    # Deterministic init mimicking nn.Linear's uniform(-1/sqrt(fan_in), 1/sqrt(fan_in)).
    bound1 = 1.0 / jnp.sqrt(jnp.float32(F))
    bound2 = 1.0 / jnp.sqrt(jnp.float32(H))
    w1_t = jax.random.uniform(kw1, (F, H), jnp.float32, -bound1, bound1)  # layer1.weight^T
    b1 = jax.random.uniform(kb1, (1, H), jnp.float32, -bound1, bound1)    # layer1.bias
    w2_t = jax.random.uniform(kw2, (H, F), jnp.float32, -bound2, bound2)  # fc.weight^T
    b2 = jax.random.uniform(kb2, (1, F), jnp.float32, -bound2, bound2)    # fc.bias

    fwd = jax.jit(kan_forward)
    out = fwd(x, w1_t, b1, w2_t, b2)
    out = jax.block_until_ready(out)

    ref = kan_reference(x, w1_t, b1, w2_t, b2)
    assert out.shape == (B, F)
    # bf16 MXU inputs with f32 accumulation -> loosened tolerance vs f32 reference.
    assert jnp.allclose(out, ref, atol=2e-2, rtol=2e-2), "mismatch vs reference"

    print("KERNEL_OK")
</pallas_src>

<mosaic_0001>
module attributes {stable_mosaic.version = 11 : i64} {
  func.func @kan_kernel(%arg0: i32, %arg1: memref<8x32xf32, #tpu.memory_space<vmem>>, %arg2: memref<32x512xbf16, #tpu.memory_space<vmem>>, %arg3: memref<1x512xf32, #tpu.memory_space<vmem>>, %arg4: memref<512x32xbf16, #tpu.memory_space<vmem>>, %arg5: memref<1x32xf32, #tpu.memory_space<vmem>>, %arg6: memref<8x32xf32, #tpu.memory_space<vmem>>) attributes {dimension_semantics = [#tpu.dimension_semantics<parallel>], iteration_bounds = array<i64: 1>, scalar_prefetch = 0 : i64, scratch_operands = 0 : i64, tpu.core_type = #tpu.core_type<tc>, window_params = [{transform_indices = @transform_0, window_bounds = array<i64: 8, 32>}, {pipeline_mode = #tpu.pipeline_mode<synchronous>, transform_indices = @transform_1, window_bounds = array<i64: 32, 512>}, {pipeline_mode = #tpu.pipeline_mode<synchronous>, transform_indices = @transform_2, window_bounds = array<i64: 1, 512>}, {pipeline_mode = #tpu.pipeline_mode<synchronous>, transform_indices = @transform_3, window_bounds = array<i64: 512, 32>}, {pipeline_mode = #tpu.pipeline_mode<synchronous>, transform_indices = @transform_4, window_bounds = array<i64: 1, 32>}, {transform_indices = @transform_5, window_bounds = array<i64: 8, 32>}]} {
    %c0 = arith.constant 0 : index
    %c0_0 = arith.constant 0 : index
    %0 = vector.load %arg1[%c0, %c0_0] : memref<8x32xf32, #tpu.memory_space<vmem>>, vector<8x32xf32>
    %1 = arith.truncf %0 : vector<8x32xf32> to vector<8x32xbf16>
    %cst = arith.constant 0.000000e+00 : f32
    %2 = vector.broadcast %cst : f32 to vector<8x32xf32>
    %c0_1 = arith.constant 0 : index
    %c0_2 = arith.constant 0 : index
    %3 = vector.load %arg2[%c0_1, %c0_2] : memref<32x512xbf16, #tpu.memory_space<vmem>>, vector<32x128xbf16>
    %cst_3 = arith.constant dense<0.000000e+00> : vector<8x128xf32>
    %4 = tpu.matmul %1, %3, %cst_3 {dimension_numbers = #tpu.dot_dimension_numbers<[1], [0], [0], [1], [0, 0, 1, 1], [], []>} : vector<8x32xbf16>, vector<32x128xbf16>, vector<8x128xf32> -> vector<8x128xf32>
    %c0_4 = arith.constant 0 : index
    %c0_5 = arith.constant 0 : index
    %5 = vector.load %arg3[%c0_4, %c0_5] : memref<1x512xf32, #tpu.memory_space<vmem>>, vector<1x128xf32>
    %6 = vector.broadcast %5 : vector<1x128xf32> to vector<8x128xf32>
    %7 = arith.addf %4, %6 : vector<8x128xf32>
    %cst_6 = arith.constant 0.000000e+00 : f32
    %8 = vector.broadcast %cst_6 : f32 to vector<8x128xf32>
    %9 = arith.maximumf %7, %8 : vector<8x128xf32>
    %10 = arith.truncf %9 : vector<8x128xf32> to vector<8x128xbf16>
    %c0_7 = arith.constant 0 : index
    %c0_8 = arith.constant 0 : index
    %11 = vector.load %arg4[%c0_7, %c0_8] : memref<512x32xbf16, #tpu.memory_space<vmem>>, vector<128x32xbf16>
    %cst_9 = arith.constant dense<0.000000e+00> : vector<8x32xf32>
    %12 = tpu.matmul %10, %11, %cst_9 {dimension_numbers = #tpu.dot_dimension_numbers<[1], [0], [0], [1], [0, 0, 1, 1], [], []>} : vector<8x128xbf16>, vector<128x32xbf16>, vector<8x32xf32> -> vector<8x32xf32>
    %13 = arith.addf %2, %12 : vector<8x32xf32>
    %c0_10 = arith.constant 0 : index
    %c128 = arith.constant 128 : index
    %14 = vector.load %arg2[%c0_10, %c128] : memref<32x512xbf16, #tpu.memory_space<vmem>>, vector<32x128xbf16>
    %cst_11 = arith.constant dense<0.000000e+00> : vector<8x128xf32>
    %15 = tpu.matmul %1, %14, %cst_11 {dimension_numbers = #tpu.dot_dimension_numbers<[1], [0], [0], [1], [0, 0, 1, 1], [], []>} : vector<8x32xbf16>, vector<32x128xbf16>, vector<8x128xf32> -> vector<8x128xf32>
    %c0_12 = arith.constant 0 : index
    %c128_13 = arith.constant 128 : index
    %16 = vector.load %arg3[%c0_12, %c128_13] : memref<1x512xf32, #tpu.memory_space<vmem>>, vector<1x128xf32>
    %17 = vector.broadcast %16 : vector<1x128xf32> to vector<8x128xf32>
    %18 = arith.addf %15, %17 : vector<8x128xf32>
    %cst_14 = arith.constant 0.000000e+00 : f32
    %19 = vector.broadcast %cst_14 : f32 to vector<8x128xf32>
    %20 = arith.maximumf %18, %19 : vector<8x128xf32>
    %21 = arith.truncf %20 : vector<8x128xf32> to vector<8x128xbf16>
    %c128_15 = arith.constant 128 : index
    %c0_16 = arith.constant 0 : index
    %22 = vector.load %arg4[%c128_15, %c0_16] : memref<512x32xbf16, #tpu.memory_space<vmem>>, vector<128x32xbf16>
    %cst_17 = arith.constant dense<0.000000e+00> : vector<8x32xf32>
    %23 = tpu.matmul %21, %22, %cst_17 {dimension_numbers = #tpu.dot_dimension_numbers<[1], [0], [0], [1], [0, 0, 1, 1], [], []>} : vector<8x128xbf16>, vector<128x32xbf16>, vector<8x32xf32> -> vector<8x32xf32>
    %24 = arith.addf %13, %23 : vector<8x32xf32>
    %c0_18 = arith.constant 0 : index
    %c256 = arith.constant 256 : index
    %25 = vector.load %arg2[%c0_18, %c256] : memref<32x512xbf16, #tpu.memory_space<vmem>>, vector<32x128xbf16>
    %cst_19 = arith.constant dense<0.000000e+00> : vector<8x128xf32>
    %26 = tpu.matmul %1, %25, %cst_19 {dimension_numbers = #tpu.dot_dimension_numbers<[1], [0], [0], [1], [0, 0, 1, 1], [], []>} : vector<8x32xbf16>, vector<32x128xbf16>, vector<8x128xf32> -> vector<8x128xf32>
    %c0_20 = arith.constant 0 : index
    %c256_21 = arith.constant 256 : index
    %27 = vector.load %arg3[%c0_20, %c256_21] : memref<1x512xf32, #tpu.memory_space<vmem>>, vector<1x128xf32>
    %28 = vector.broadcast %27 : vector<1x128xf32> to vector<8x128xf32>
    %29 = arith.addf %26, %28 : vector<8x128xf32>
    %cst_22 = arith.constant 0.000000e+00 : f32
    %30 = vector.broadcast %cst_22 : f32 to vector<8x128xf32>
    %31 = arith.maximumf %29, %30 : vector<8x128xf32>
    %32 = arith.truncf %31 : vector<8x128xf32> to vector<8x128xbf16>
    %c256_23 = arith.constant 256 : index
    %c0_24 = arith.constant 0 : index
    %33 = vector.load %arg4[%c256_23, %c0_24] : memref<512x32xbf16, #tpu.memory_space<vmem>>, vector<128x32xbf16>
    %cst_25 = arith.constant dense<0.000000e+00> : vector<8x32xf32>
    %34 = tpu.matmul %32, %33, %cst_25 {dimension_numbers = #tpu.dot_dimension_numbers<[1], [0], [0], [1], [0, 0, 1, 1], [], []>} : vector<8x128xbf16>, vector<128x32xbf16>, vector<8x32xf32> -> vector<8x32xf32>
    %35 = arith.addf %24, %34 : vector<8x32xf32>
    %c0_26 = arith.constant 0 : index
    %c384 = arith.constant 384 : index
    %36 = vector.load %arg2[%c0_26, %c384] : memref<32x512xbf16, #tpu.memory_space<vmem>>, vector<32x128xbf16>
    %cst_27 = arith.constant dense<0.000000e+00> : vector<8x128xf32>
    %37 = tpu.matmul %1, %36, %cst_27 {dimension_numbers = #tpu.dot_dimension_numbers<[1], [0], [0], [1], [0, 0, 1, 1], [], []>} : vector<8x32xbf16>, vector<32x128xbf16>, vector<8x128xf32> -> vector<8x128xf32>
    %c0_28 = arith.constant 0 : index
    %c384_29 = arith.constant 384 : index
    %38 = vector.load %arg3[%c0_28, %c384_29] : memref<1x512xf32, #tpu.memory_space<vmem>>, vector<1x128xf32>
    %39 = vector.broadcast %38 : vector<1x128xf32> to vector<8x128xf32>
    %40 = arith.addf %37, %39 : vector<8x128xf32>
    %cst_30 = arith.constant 0.000000e+00 : f32
    %41 = vector.broadcast %cst_30 : f32 to vector<8x128xf32>
    %42 = arith.maximumf %40, %41 : vector<8x128xf32>
    %43 = arith.truncf %42 : vector<8x128xf32> to vector<8x128xbf16>
    %c384_31 = arith.constant 384 : index
    %c0_32 = arith.constant 0 : index
    %44 = vector.load %arg4[%c384_31, %c0_32] : memref<512x32xbf16, #tpu.memory_space<vmem>>, vector<128x32xbf16>
    %cst_33 = arith.constant dense<0.000000e+00> : vector<8x32xf32>
    %45 = tpu.matmul %43, %44, %cst_33 {dimension_numbers = #tpu.dot_dimension_numbers<[1], [0], [0], [1], [0, 0, 1, 1], [], []>} : vector<8x128xbf16>, vector<128x32xbf16>, vector<8x32xf32> -> vector<8x32xf32>
    %46 = arith.addf %35, %45 : vector<8x32xf32>
    %c0_34 = arith.constant 0 : index
    %c0_35 = arith.constant 0 : index
    %47 = vector.load %arg5[%c0_34, %c0_35] : memref<1x32xf32, #tpu.memory_space<vmem>>, vector<1x32xf32>
    %48 = vector.broadcast %47 : vector<1x32xf32> to vector<8x32xf32>
    %49 = arith.addf %46, %48 : vector<8x32xf32>
    %c0_36 = arith.constant 0 : index
    %c0_37 = arith.constant 0 : index
    %50 = vector.load %arg6[%c0_36, %c0_37] : memref<8x32xf32, #tpu.memory_space<vmem>>, vector<8x32xf32>
    tpu.vector_store %arg6[%c0_36, %c0_37], %49 {strides = array<i32>} : memref<8x32xf32, #tpu.memory_space<vmem>>, vector<8x32xf32>,
    return
  }
  func.func @transform_0(%arg0: i32) -> (i32, i32) {
    %c0_i32 = arith.constant 0 : i32
    %c0_i32_0 = arith.constant 0 : i32
    return %arg0, %c0_i32 : i32, i32
  }
  func.func @transform_1(%arg0: i32) -> (i32, i32) {
    %c0_i32 = arith.constant 0 : i32
    %c0_i32_0 = arith.constant 0 : i32
    %c0_i32_1 = arith.constant 0 : i32
    return %c0_i32, %c0_i32_0 : i32, i32
  }
  func.func @transform_2(%arg0: i32) -> (i32, i32) {
    %c0_i32 = arith.constant 0 : i32
    %c0_i32_0 = arith.constant 0 : i32
    %c0_i32_1 = arith.constant 0 : i32
    return %c0_i32, %c0_i32_0 : i32, i32
  }
  func.func @transform_3(%arg0: i32) -> (i32, i32) {
    %c0_i32 = arith.constant 0 : i32
    %c0_i32_0 = arith.constant 0 : i32
    %c0_i32_1 = arith.constant 0 : i32
    return %c0_i32, %c0_i32_0 : i32, i32
  }
  func.func @transform_4(%arg0: i32) -> (i32, i32) {
    %c0_i32 = arith.constant 0 : i32
    %c0_i32_0 = arith.constant 0 : i32
    %c0_i32_1 = arith.constant 0 : i32
    return %c0_i32, %c0_i32_0 : i32, i32
  }
  func.func @transform_5(%arg0: i32) -> (i32, i32) {
    %c0_i32 = arith.constant 0 : i32
    %c0_i32_0 = arith.constant 0 : i32
    return %arg0, %c0_i32 : i32, i32
  }
}

</mosaic_0001>

<bundles_post_ra>
// kernel: kan_forward.1
= control target key start
LH: loop header
LB: loop body
LE: loop exit
PB: predicated region body
PF: predicated region fallthrough
CT: control target
= control target key end

     0   :  { %v1005_v0 = vmov 0.0   ;;  %vm1006_vm0 = vmmov 0   ;;  %vm47_vm1 = vcmask 261120   ;;  %s1255_s0 = inlined_call_operand.vmem [shape: f32[8,32], index: 0, kind: input, shape index: {}]   ;;  %s1256_s1 = inlined_call_operand.vmem [shape: bf16[32,512], index: 1, kind: input, shape index: {}]   ;;  %s1257_s2 = inlined_call_operand.vmem [shape: f32[1,512], index: 2, kind: input, shape index: {}]   ;;  %s1258_s3 = inlined_call_operand.vmem [shape: bf16[512,32], index: 3, kind: input, shape index: {}]   ;;  %s1259_s4 = inlined_call_operand.vmem [shape: f32[1,32], index: 4, kind: input, shape index: {}]   ;;  %s1260_s5 = inlined_call_operand.hbm [shape: f32[8,32], index: 5, kind: output, shape index: {}]  }
   0x1   :  { %826 = vmatprep.subr.bf16.mxu1 %v1005_v0  ;;  %v941_v1 = vld [vmem:[%s1256_s1] ss:$16 sps:$4 sm:$0xff]   ;;  %830 = vmatprep.mubr.msk.bf16.mxu1 %vm1006_vm0, %v1005_v0  ;;  %v943_v5 = vld [vmem:[%s1256_s1 + $0x4] ss:$16 sps:$4 sm:$0xff]   ;;  %v949_v7 = vld [vmem:[%s1258_s3 + $0x48] sm:$0xff]  }
   0x2   :  { %v942_v2 = vld [vmem:[%s1256_s1 + $0x20] ss:$16 sps:$4 sm:$0xff]   ;;  %842 = vmatprep.subr.bf16.mxu0 %v1005_v0  ;;  %858 = vmatprep.mubr.msk.bf16.mxu0 %vm1006_vm0, %v1005_v0  ;;  %v944_v8 = vld [vmem:[%s1256_s1 + $0x24] ss:$16 sps:$4 sm:$0xff]   ;;  %v953_v11 = vld [vmem:[%s1258_s3 + $0x58] sm:$0xff]  }
   0x3   :  { %827 = vmatpush3.bf16.msra.mxu1 %v941_v1  ;;  %v22_v3 = vld [vmem:[%s1255_s0] sm:$0xff]  ;;  %v951_v9 = vld [vmem:[%s1258_s3 + $0x50] sm:$0xff]   ;;  %v946_v12 = vld [vmem:[%s1258_s3 + $0x8] sm:$0xff]  }
   0x4   :  { %828 = vmatprep.subr.bf16.mxu1 %v1005_v0  ;;  %v1054_v4 = vpack.c.bf16 %v22_v3, %v22_v3  ;;  %v947_v6 = vld [vmem:[%s1258_s3 + $0x40] sm:$0xff]   ;;  %v948_v13 = vld [vmem:[%s1258_s3 + $0x10] sm:$0xff]   ;;  %v950_v14 = vld [vmem:[%s1258_s3 + $0x18] sm:$0xff]  }
   0x5   :  { %843 = vmatpush3.bf16.msra.mxu0 %v947_v6  ;;  %v945_v10 = vld [vmem:[%s1258_s3] sm:$0xff]  }
   0x6   :  { %844 = vmatprep.subr.bf16.mxu0 %v1005_v0  ;;  %v952_v15 = vld [vmem:[%s1258_s3 + $0x20] sm:$0xff]  }
   0x7   :  { %829 = vmatpush3.bf16.msra.mxu1 %v942_v2 }
   0x8   :  { %834 = vmatprep.subr.bf16.mxu1 %v1005_v0 }
   0x9   :  { %845 = vmatpush3.bf16.msra.mxu0 %v949_v7 }
   0xa   :  { %831 = vmatmul.mubr.msk.bf16.vlgmr.msra.gmra.mrb[0].mxu1 %vm47_vm1, %v1054_v4  ;;  %846 = vmatprep.subr.bf16.mxu0 %v1005_v0 }
   0xb   :  { %835 = vmatpush3.bf16.msra.mxu1 %v943_v5  ;;  %838 = vmatprep.mubr.msk.bf16.mxu1 %vm1006_vm0, %v1005_v0 }
   0xc   :  { %836 = vmatprep.subr.bf16.mxu1 %v1005_v0 }
   0xd   :  { %847 = vmatpush3.bf16.msra.mxu0 %v951_v9 }
   0xe   :  { %848 = vmatprep.subr.bf16.mxu0 %v1005_v0 }
   0xf   :  { %837 = vmatpush3.bf16.msra.mxu1 %v944_v8 }
  0x10   :  { %862 = vmatprep.subr.bf16.mxu1 %v1005_v0 }
  0x11   :  { %849 = vmatpush3.bf16.msra.mxu0 %v953_v11 }
  0x12   :  { %839 = vmatmul.mubr.msk.bf16.vlgmr.msra.gmra.mrb[4].mxu1 %vm47_vm1, %v1054_v4  ;;  %850 = vmatprep.subr.bf16.mxu0 %v1005_v0 }
  0x13   :  { %863 = vmatpush3.bf16.msra.mxu1 %v945_v10  ;;  %878 = vmatprep.mubr.msk.bf16.mxu1 %vm1006_vm0, %v1005_v0 }
  0x14   :  { %864 = vmatprep.subr.bf16.mxu1 %v1005_v0 }
  0x17   :  { %865 = vmatpush3.bf16.msra.mxu1 %v946_v12 }
  0x18   :  { %866 = vmatprep.subr.bf16.mxu1 %v1005_v0 }
  0x1b   :  { %867 = vmatpush3.bf16.msra.mxu1 %v948_v13 }
  0x1c   :  { %868 = vmatprep.subr.bf16.mxu1 %v1005_v0 }
  0x1f   :  { %869 = vmatpush3.bf16.msra.mxu1 %v950_v14 }
  0x20   :  { %870 = vmatprep.subr.bf16.mxu1 %v1005_v0 }
  0x21   :  { %10 = vsyncpa [#allocation3], 0  ;;  %v954_v16 = vld [vmem:[%s1258_s3 + $0x28] sm:$0xff]   ;;  %v955_v17 = vld [vmem:[%s1258_s3 + $0x60] sm:$0xff]  }
  0x22   :  { %v956_v18 = vld [vmem:[%s1258_s3 + $0x30] sm:$0xff]   ;;  %851 = vmatpush3.bf16.msra.mxu0 %v955_v17  ;;  %v957_v19 = vld [vmem:[%s1258_s3 + $0x68] sm:$0xff]   ;;  %v958_v20 = vld [vmem:[%s1258_s3 + $0x38] sm:$0xff]  }
  0x23   :  { %871 = vmatpush3.bf16.msra.mxu1 %v952_v15  ;;  %852 = vmatprep.subr.bf16.mxu0 %v1005_v0  ;;  %v959_v21 = vld [vmem:[%s1258_s3 + $0x70] sm:$0xff]   ;;  %v960_v22 = vld [vmem:[%s1258_s3 + $0x78] sm:$0xff]   ;;  %v729_v23 = vld [vmem:[%s1257_s2] ss:$0 sm:$0xff] }
  0x24   :  { %872 = vmatprep.subr.bf16.mxu1 %v1005_v0  ;;  %v965_v30 = vld [vmem:[%s1258_s3 + $0x80] sm:$0xff]   ;;  %v966_v34 = vld [vmem:[%s1258_s3 + $0x88] sm:$0xff]   ;;  %v967_v45 = vld [vmem:[%s1258_s3 + $0x90] sm:$0xff]  }
  0x25   :  { %v733_v32 = vld [vmem:[%s1257_s2 + $0x1] ss:$0 sm:$0xff]  ;;  %v961_v40 = vld [vmem:[%s1256_s1 + $0x8] ss:$16 sps:$4 sm:$0xff]   ;;  %v963_v43 = vld [vmem:[%s1256_s1 + $0xc] ss:$16 sps:$4 sm:$0xff]  }
  0x26   :  { %853 = vmatpush3.bf16.msra.mxu0 %v957_v19  ;;  %v962_v42 = vld [vmem:[%s1256_s1 + $0x28] ss:$16 sps:$4 sm:$0xff]   ;;  %v964_v44 = vld [vmem:[%s1256_s1 + $0x2c] ss:$16 sps:$4 sm:$0xff]   ;;  %v968_v46 = vld [vmem:[%s1258_s3 + $0xc0] sm:$0xff]  }
  0x27   :  { %873 = vmatpush3.bf16.msra.mxu1 %v954_v16  ;;  %854 = vmatprep.subr.bf16.mxu0 %v1005_v0  ;;  %v969_v47 = vld [vmem:[%s1258_s3 + $0x98] sm:$0xff]   ;;  %v970_v48 = vld [vmem:[%s1258_s3 + $0xc8] sm:$0xff]   ;;  %v971_v49 = vld [vmem:[%s1258_s3 + $0xa0] sm:$0xff]  }
  0x28   :  { %874 = vmatprep.subr.bf16.mxu1 %v1005_v0  ;;  %v972_v50 = vld [vmem:[%s1258_s3 + $0xd0] sm:$0xff]   ;;  %v973_v51 = vld [vmem:[%s1258_s3 + $0xa8] sm:$0xff]   ;;  %v974_v52 = vld [vmem:[%s1258_s3 + $0xd8] sm:$0xff]  }
  0x29   :  { %v975_v53 = vld [vmem:[%s1258_s3 + $0xb0] sm:$0xff]   ;;  %v976_v54 = vld [vmem:[%s1258_s3 + $0xe0] sm:$0xff]   ;;  %v977_v55 = vld [vmem:[%s1258_s3 + $0xb8] sm:$0xff]  }
  0x2a   :  { %855 = vmatpush3.bf16.msra.mxu0 %v959_v21  ;;  %v978_v56 = vld [vmem:[%s1258_s3 + $0xe8] sm:$0xff]   ;;  %v979_v57 = vld [vmem:[%s1258_s3 + $0xf0] sm:$0xff]   ;;  %v980_v58 = vld [vmem:[%s1258_s3 + $0xf8] sm:$0xff]  }
  0x2b   :  { %875 = vmatpush3.bf16.msra.mxu1 %v956_v18  ;;  %856 = vmatprep.subr.bf16.mxu0 %v1005_v0  ;;  %v753_v5 = vld [vmem:[%s1257_s2 + $0x2] ss:$0 sm:$0xff]  ;;  %v765_v12 = vld [vmem:[%s1257_s2 + $0x3] ss:$0 sm:$0xff]  ;;  %s1007_s2 = smov [#allocation2]  }
  0x2c   :  { %876 = vmatprep.subr.bf16.mxu1 %v1005_v0  ;;  %s721_s29 = sshll.u32 %s1007_s2, 4  ;;  %s722_s29 = int_to_ptr.vmem [resolvable:$true] %s721_s29 }
  0x2d   :  { %s981_s0 = scalar_lea.vmem %s722_s29, 128  ;;  %p986_p1 = scmp.lt.s32.totalorder %s722_s29, %s722_s29 }
  0x2e   :  { %857 = vmatpush3.bf16.msra.mxu0 %v960_v22  ;;  %p982_p0 = scmp.ne.s32.totalorder %s722_s29, %s981_s0  ;;  %p987_p2 = scmp.lt.s32.totalorder %s981_s0, %s981_s0 }
  0x2f   :  { %877 = vmatpush3.bf16.msra.mxu1 %v958_v20  ;;  %882 = vmatprep.subr.bf16.mxu0 %v1005_v0 }
  0x30   :  { %890 = vmatprep.subr.bf16.mxu1 %v1005_v0  ;;  %p988_p3 = por %p987_p2, %p986_p1 }
  0x32   :  { %p989_p4 = pnand %p988_p3, %p982_p0 }
  0xdd   :  { %v85_v24 = vpop.f32.mrb[0].mxu1 }
  0xde   :  { %v86_v25 = vadd.f32 %v729_v23, %v85_v24  ;;  %v832_v26 = vpop.f32.mrb[1].mxu1 }
  0xdf   :  { %v88_v27 = vpop.f32.mrb[2].mxu1  ;;  %v777_v26 = vld [vmem:[%s1259_s4] ss:$0 sm:$0xff] }
  0xe0   :  { %v91_v28 = vmax.f32 %v86_v25, 0.0  ;;  %v833_v29 = vpop.f32.mrb[3].mxu1 }
  0xe2   :  { %v92_v31 = vpack.c.bf16 %v91_v28, %v91_v28 }
  0xe4   :  { %879 = vmatmul.mubr.bf16.vlgmr.msra.gmra.mrb[8].mxu1 %v92_v31 }
  0xe5   :  { %v166_v33 = vpop.f32.mrb[4].mxu1  ;;  %891 = vmatpush3.bf16.msra.mxu1 %v965_v30  ;;  %906 = vmatprep.mubr.msk.bf16.mxu1 %vm1006_vm0, %v1005_v0 }
  0xe6   :  { %v167_v35 = vadd.f32 %v733_v32, %v166_v33  ;;  %v840_v36 = vpop.f32.mrb[5].mxu1  ;;  %892 = vmatprep.subr.bf16.mxu1 %v1005_v0 }
  0xe7   :  { %v169_v37 = vpop.f32.mrb[6].mxu1 }
  0xe8   :  { %v172_v38 = vmax.f32 %v167_v35, 0.0  ;;  %v841_v39 = vpop.f32.mrb[7].mxu1 }
  0xe9   :  { %893 = vmatpush3.bf16.msra.mxu1 %v966_v34 }
  0xea   :  { %v173_v41 = vpack.c.bf16 %v172_v38, %v172_v38  ;;  %894 = vmatprep.subr.bf16.mxu1 %v1005_v0 }
  0xec   :  { %859 = vmatmul.mubr.bf16.vlgmr.msra.gmra.mrb[0].mxu0 %v173_v41 }
  0xed   :  { %883 = vmatpush3.bf16.msra.mxu0 %v961_v40  ;;  %886 = vmatprep.mubr.msk.bf16.mxu0 %vm1006_vm0, %v1005_v0 }
  0xee   :  { %884 = vmatprep.subr.bf16.mxu0 %v1005_v0  ;;  %895 = vmatpush3.bf16.msra.mxu1 %v967_v45 }
  0xef   :  { %896 = vmatprep.subr.bf16.mxu1 %v1005_v0 }
  0xf1   :  { %885 = vmatpush3.bf16.msra.mxu0 %v962_v42 }
  0xf2   :  { %910 = vmatprep.subr.bf16.mxu0 %v1005_v0  ;;  %897 = vmatpush3.bf16.msra.mxu1 %v969_v47 }
  0xf3   :  { %898 = vmatprep.subr.bf16.mxu1 %v1005_v0 }
  0xf4   :  { %887 = vmatmul.mubr.msk.bf16.vlgmr.msra.gmra.mrb[4].mxu0 %vm47_vm1, %v1054_v4 }
  0xf5   :  { %911 = vmatpush3.bf16.msra.mxu0 %v963_v43  ;;  %914 = vmatprep.mubr.msk.bf16.mxu0 %vm1006_vm0, %v1005_v0 }
  0xf6   :  { %912 = vmatprep.subr.bf16.mxu0 %v1005_v0  ;;  %899 = vmatpush3.bf16.msra.mxu1 %v971_v49 }
  0xf7   :  { %900 = vmatprep.subr.bf16.mxu1 %v1005_v0 }
  0xf9   :  { %913 = vmatpush3.bf16.msra.mxu0 %v964_v44 }
  0xfa   :  { %918 = vmatprep.subr.bf16.mxu0 %v1005_v0  ;;  %901 = vmatpush3.bf16.msra.mxu1 %v973_v51 }
  0xfb   :  { %902 = vmatprep.subr.bf16.mxu1 %v1005_v0 }
  0xfc   :  { %915 = vmatmul.mubr.msk.bf16.vlgmr.msra.gmra.mrb[8].mxu0 %vm47_vm1, %v1054_v4 }
  0xfd   :  { %934 = vmatprep.mubr.msk.bf16.mxu0 %vm1006_vm0, %v1005_v0  ;;  %919 = vmatpush3.bf16.msra.mxu0 %v968_v46 }
  0xfe   :  { %920 = vmatprep.subr.bf16.mxu0 %v1005_v0  ;;  %903 = vmatpush3.bf16.msra.mxu1 %v975_v53 }
  0xff   :  { %904 = vmatprep.subr.bf16.mxu1 %v1005_v0 }
 0x101   :  { %921 = vmatpush3.bf16.msra.mxu0 %v970_v48 }
 0x102   :  { %922 = vmatprep.subr.bf16.mxu0 %v1005_v0  ;;  %905 = vmatpush3.bf16.msra.mxu1 %v977_v55 }
 0x105   :  { %923 = vmatpush3.bf16.msra.mxu0 %v972_v50 }
 0x106   :  { %924 = vmatprep.subr.bf16.mxu0 %v1005_v0 }
 0x109   :  { %925 = vmatpush3.bf16.msra.mxu0 %v974_v52 }
 0x10a   :  { %926 = vmatprep.subr.bf16.mxu0 %v1005_v0 }
 0x10d   :  { %927 = vmatpush3.bf16.msra.mxu0 %v976_v54 }
 0x10e   :  { %928 = vmatprep.subr.bf16.mxu0 %v1005_v0 }
 0x111   :  { %929 = vmatpush3.bf16.msra.mxu0 %v978_v56 }
 0x112   :  { %930 = vmatprep.subr.bf16.mxu0 %v1005_v0 }
 0x115   :  { %931 = vmatpush3.bf16.msra.mxu0 %v979_v57 }
 0x116   :  { %932 = vmatprep.subr.bf16.mxu0 %v1005_v0 }
 0x119   :  { %933 = vmatpush3.bf16.msra.mxu0 %v980_v58 }
 0x1b7   :  { %v360_v59 = vpop.f32.mrb[8].mxu1 }
 0x1b8   :  { %v880_v60 = vpop.f32.mrb[9].mxu1 }
 0x1b9   :  { %v363_v61 = vpop.f32.mrb[10].mxu1 }
 0x1ba   :  { %v881_v62 = vpop.f32.mrb[11].mxu1 }
 0x1bf   :  { %v272_v63 = vpop.f32.mrb[0].mxu0 }
 0x1c0   :  { %v361_v1 = vadd.f32 %v360_v59, %v272_v63  ;;  %v860_v2 = vpop.f32.mrb[1].mxu0 }
 0x1c1   :  { %v275_v3 = vpop.f32.mrb[2].mxu0 }
 0x1c2   :  { %v861_v4 = vpop.f32.mrb[3].mxu0 }
 0x1c7   :  { %v423_v6 = vpop.f32.mrb[4].mxu0 }
 0x1c8   :  { %v424_v0 = vadd.f32 %v753_v5, %v423_v6  ;;  %v888_v7 = vpop.f32.mrb[5].mxu0 }
 0x1c9   :  { %v426_v8 = vpop.f32.mrb[6].mxu0 }
 0x1ca   :  { %v429_v9 = vmax.f32 %v424_v0, 0.0  ;;  %v889_v10 = vpop.f32.mrb[7].mxu0 }
 0x1cc   :  { %v430_v11 = vpack.c.bf16 %v429_v9, %v429_v9 }
 0x1ce   :  { %907 = vmatmul.mubr.bf16.vlgmr.msra.gmra.mrb[12].mxu1 %v430_v11 }
 0x1cf   :  { %v593_v13 = vpop.f32.mrb[8].mxu0 }
 0x1d0   :  { %v594_v14 = vadd.f32 %v765_v12, %v593_v13  ;;  %v916_v15 = vpop.f32.mrb[9].mxu0 }
 0x1d1   :  { %v596_v16 = vpop.f32.mrb[10].mxu0 }
 0x1d2   :  { %v599_v17 = vmax.f32 %v594_v14, 0.0  ;;  %v917_v18 = vpop.f32.mrb[11].mxu0 }
 0x1d4   :  { %v600_v19 = vpack.c.bf16 %v599_v17, %v599_v17 }
 0x1d6   :  { %935 = vmatmul.mubr.bf16.vlgmr.msra.gmra.mrb[12].mxu0 %v600_v19 }
 0x2a1   :  { %v529_v20 = vpop.f32.mrb[12].mxu1 }
 0x2a2   :  { %v535_v21 = vadd.f32 %v529_v20, %v361_v1  ;;  %v908_v22 = vpop.f32.mrb[13].mxu1 }
 0x2a3   :  { %v532_v23 = vpop.f32.mrb[14].mxu1 }
 0x2a4   :  { %v909_v24 = vpop.f32.mrb[15].mxu1 }
 0x2a9   :  { %v699_v25 = vpop.f32.mrb[12].mxu0 }
 0x2aa   :  { %v705_v27 = vadd.f32 %v699_v25, %v535_v21  ;;  %v936_v28 = vpop.f32.mrb[13].mxu0 }
 0x2ab   :  { %v702_v29 = vpop.f32.mrb[14].mxu0 }
 0x2ac   :  { %v713_v30 = vadd.f32 %v777_v26, %v705_v27  ;;  %v937_v31 = vpop.f32.mrb[15].mxu0 }
 0x2ae   :  { %714 = vst.msk [vmem:[#allocation2] sm:$0xff] %vm47_vm1, %v713_v30 }
 0x2af   :  { %992 = shalt.err (!%p989_p4)
}
 0x2b0   :  { %s993_s4 = scalar_lea.hbm %s1260_s5, 128 }
 0x2b1   :  { %p994_p5 = scmp.ne.s32.totalorder %s1260_s5, %s993_s4  ;;  %p997_p6 = scmp.lt.u32.totalorder %s993_s4, %s1260_s5 }
 0x2b3   :  { %p999_p7 = pnand %p997_p6, %p994_p5 }
 0x2b5   :  { %1002 = shalt.err (!%p999_p7)
}
 0x2b6   :  { %724 = dma.vmem_to_hbm [thread:$0]  %s722_s29, 128, %s1260_s5, [#allocation3]  }
 0x2b7   :  { %1003 = dma.done.wait [#allocation3], 128  }
 0x2b8   :  { %1004 = vsyncadd [#allocation3], 4294967168 }
 0x2b9   :  { %728 = vsyncpa [#allocation3], 1 }

</bundles_post_ra>
